<compile_context>
chip_gen: v6e
topology: v6e:2x2x1
jax: 0.10.0
libtpu: 0.0.40
codegen_flags: <defaults>
</compile_context>

<pallas_src>
import functools

import jax
import jax.numpy as jnp
from jax import lax
from jax.experimental import pallas as pl
from jax.experimental.pallas import tpu as pltpu


_GATHER_MIN_CLASSES = 512  # below this, the in-kernel one-hot path is cheaper


def _label_smoothing_kernel(logits_ref, side_ref, out_ref, *, num_class, gathered):
    """Per-row smoothed-CE loss for one batch tile.

    logits_ref: [TB, C] native dtype (bf16/f32...), upcast in-kernel.
    side_ref:   [TB, 2] f32; col 0 = bias[label]; col 1 = label id (small C)
                or logits[label] (large C, gathered in the wrapper).
    out_ref:    [TB, 1] f32 per-row loss (batch mean is taken in the wrapper).
    """
    logits = logits_ref[...].astype(jnp.float32)                           # [TB, C]
    tb, c = logits.shape
    side = side_ref[...]                                                   # [TB, 2]
    bias_lbl = side[:, 0:1]                                                # [TB, 1]

    # log-softmax pieces: logp = (x - m) - log(sum exp(x - m))
    m = jnp.max(logits, axis=1, keepdims=True)                             # [TB, 1]
    shifted = logits - m                                                   # [TB, C]
    log_denom = jnp.log(jnp.sum(jnp.exp(shifted), axis=1, keepdims=True))  # [TB, 1]

    if gathered:
        # logits[label] gathered in the wrapper -> no iota/one-hot/extra reduce.
        lp_label = (side[:, 1:2] - m) - log_denom                          # [TB, 1]
    else:
        labels_i = side[:, 1:2].astype(jnp.int32)        # exact for small class ids
        cls_idx = lax.broadcasted_iota(jnp.int32, (tb, c), 1)
        one_hot = (labels_i == cls_idx).astype(jnp.float32)                # [TB, C]
        lp_label = jnp.sum(one_hot * shifted, axis=1, keepdims=True) - log_denom

    # sum_c logp_c = sum_c shifted_c - C * log_denom
    sum_lp = jnp.sum(shifted, axis=1, keepdims=True) - float(c) * log_denom  # [TB, 1]

    # alpha = sum_c one_hot_c * exp(bias_c) = exp(bias[label])   (one exp per row)
    alpha = jnp.exp(bias_lbl)                                              # [TB, 1]

    # loss_row = -(1-alpha)*logp[label] - (alpha/num_class)*sum_c logp_c
    out_ref[...] = (-(1.0 - alpha) * lp_label
                    - (alpha / float(num_class)) * sum_lp)


def _vmem_capacity_bytes():
    try:
        cap = int(pltpu.get_tpu_info().vmem_capacity_bytes)
        if cap > 0:
            return cap
    except Exception:
        pass
    return 64 * 1024 * 1024  # v7x floor; conservative on 128 MiB parts


def _auto_block_b(n_cls, itemsize, vmem_cap):
    # Live [TB, C] slabs per step: double-buffered streamed tile (native dtype)
    # + up to ~4 f32 temporaries (f32 upcast, shifted, exp, one_hot/scratch).
    bytes_per_row = n_cls * (2 * itemsize + 4 * 4)
    budget = int(vmem_cap * 0.55)
    blk = budget // max(bytes_per_row, 1)
    blk = min(blk, 32768)          # no tiny 1024 cap; keep compile times sane
    return max(8, (blk // 8) * 8)


def label_smoothing_loss(hidden, logits, bias, labels, *, num_class, block_b=None):
    """Pallas implementation of LabelSmoothing.forward.

    hidden is accepted for API parity but (like the PyTorch module) unused.
    """
    del hidden  # not used by the forward pass
    B, C = logits.shape
    itemsize = jnp.dtype(logits.dtype).itemsize
    vmem_cap = _vmem_capacity_bytes()

    if block_b is None:
        block_b = _auto_block_b(C, itemsize, vmem_cap)
    block_b = int(min(block_b, B))
    if block_b % 8 != 0:
        block_b = B  # full-array block is always a legal BlockSpec

    grid_b = pl.cdiv(B, block_b)
    gathered = C >= _GATHER_MIN_CLASSES

    labels_2d = labels.astype(jnp.int32)[:, None]                          # [B, 1]
    # Gather bias log-prob at the gold label up front: kernel streams only
    # [B, 2] of side data instead of the full [B, C] bias.
    bias_at_label = jnp.take_along_axis(bias.astype(jnp.float32), labels_2d, axis=1)
    if gathered:
        col1 = jnp.take_along_axis(logits, labels_2d, axis=1).astype(jnp.float32)
    else:
        col1 = labels_2d.astype(jnp.float32)
    side = jnp.concatenate([bias_at_label, col1], axis=1)                  # [B, 2] f32

    kernel = functools.partial(
        _label_smoothing_kernel, num_class=num_class, gathered=gathered)

    # ~48 MiB on 64 MiB parts (v7x), ~96-100 MiB on 128 MiB parts (v5e/v6e,
    # whose 16/32 MiB scoped defaults are far too small for big tiles).
    vmem_limit_bytes = int(min(vmem_cap * 3 // 4, 100 * 1024 * 1024))

    per_row = pl.pallas_call(
        kernel,
        out_shape=jax.ShapeDtypeStruct((B, 1), jnp.float32),
        grid_spec=pltpu.PrefetchScalarGridSpec(
            num_scalar_prefetch=0,
            grid=(grid_b,),
            in_specs=[
                pl.BlockSpec((block_b, C), lambda i: (i, 0)),   # logits tile (native dtype)
                pl.BlockSpec((block_b, 2), lambda i: (i, 0)),   # packed side data
            ],
            out_specs=pl.BlockSpec((block_b, 1), lambda i: (i, 0)),  # per-row loss
        ),
        compiler_params=pltpu.CompilerParams(
            dimension_semantics=("parallel",),   # independent tiles -> megacore on v7x
            vmem_limit_bytes=vmem_limit_bytes,
        ),
    )(logits, side)

    return jnp.mean(per_row)


def _reference_loss(hidden, logits, bias, labels, *, num_class):
    """Pure-JAX reference mirroring the PyTorch code, for a sanity check."""
    del hidden
    probs = jax.nn.softmax(logits.astype(jnp.float32), axis=1)
    one_hot = jnp.eye(logits.shape[1], dtype=jnp.float32)[labels]
    alphas = jnp.sum(one_hot * jnp.exp(bias.astype(jnp.float32)), axis=1, keepdims=True)
    target = (1.0 - alphas) * one_hot + alphas / float(num_class)
    example_loss = -jnp.sum(target * jnp.log(probs), axis=1)
    return jnp.mean(example_loss)


if __name__ == "__main__":
    key = jax.random.PRNGKey(0)
    batch, n_features = 20, 32

    # Case 1: small C (in-kernel one-hot path); block_b=8 over batch=20 gives a
    # 3-step "parallel" grid with a ragged final tile.
    n_classes = 6
    k1, k2, k3, k4 = jax.random.split(key, 4)
    hidden = jax.random.normal(k1, (batch, n_features), dtype=jnp.float32)
    logits = jax.random.normal(k2, (batch, n_classes), dtype=jnp.float32)
    bias = jax.nn.log_softmax(
        jax.random.normal(k3, (batch, n_classes), dtype=jnp.float32), axis=1)
    labels = jax.random.randint(k4, (batch,), 0, n_classes, dtype=jnp.int32)

    loss = jax.block_until_ready(
        label_smoothing_loss(hidden, logits, bias, labels,
                             num_class=n_classes, block_b=8))
    ref = _reference_loss(hidden, logits, bias, labels, num_class=n_classes)
    assert jnp.allclose(loss, ref, rtol=2e-5, atol=2e-5), (loss, ref)

    # Case 2: larger C (wrapper gathers logits[label]; no one-hot in-kernel),
    # still a ragged multi-tile grid.
    n_classes2 = 640
    k5, k6, k7 = jax.random.split(k4, 3)
    logits2 = jax.random.normal(k5, (batch, n_classes2), dtype=jnp.float32)
    bias2 = jax.nn.log_softmax(
        jax.random.normal(k6, (batch, n_classes2), dtype=jnp.float32), axis=1)
    labels2 = jax.random.randint(k7, (batch,), 0, n_classes2, dtype=jnp.int32)

    loss2 = jax.block_until_ready(
        label_smoothing_loss(hidden, logits2, bias2, labels2,
                             num_class=n_classes2, block_b=8))
    ref2 = _reference_loss(hidden, logits2, bias2, labels2, num_class=n_classes2)
    assert jnp.allclose(loss2, ref2, rtol=2e-5, atol=2e-5), (loss2, ref2)

    print("KERNEL_OK")
</pallas_src>

<mosaic_0001>
module attributes {stable_mosaic.version = 11 : i64} {
  func.func @_label_smoothing_kernel(%arg0: i32, %arg1: memref<8x6xf32, #tpu.memory_space<vmem>>, %arg2: memref<8x2xf32, #tpu.memory_space<vmem>>, %arg3: memref<8x1xf32, #tpu.memory_space<vmem>>) attributes {dimension_semantics = [#tpu.dimension_semantics<parallel>], iteration_bounds = array<i64: 3>, scalar_prefetch = 0 : i64, scratch_operands = 0 : i64, tpu.core_type = #tpu.core_type<tc>, window_params = [{transform_indices = @transform_0, window_bounds = array<i64: 8, 6>}, {transform_indices = @transform_1, window_bounds = array<i64: 8, 2>}, {transform_indices = @transform_2, window_bounds = array<i64: 8, 1>}]} {
    %c0 = arith.constant 0 : index
    %c0_0 = arith.constant 0 : index
    %0 = vector.load %arg1[%c0, %c0_0] : memref<8x6xf32, #tpu.memory_space<vmem>>, vector<8x6xf32>
    %c0_1 = arith.constant 0 : index
    %c0_2 = arith.constant 0 : index
    %1 = vector.load %arg2[%c0_1, %c0_2] : memref<8x2xf32, #tpu.memory_space<vmem>>, vector<8x2xf32>
    %2 = vector.extract_strided_slice %1 {offsets = [0, 0], sizes = [8, 1], strides = [1, 1]} : vector<8x2xf32> to vector<8x1xf32>
    %cst = arith.constant dense<0xFF800000> : vector<8xf32>
    %3 = vector.multi_reduction <maximumf>, %0, %cst [1] : vector<8x6xf32> to vector<8xf32>
    %4 = vector.shape_cast %3 : vector<8xf32> to vector<8x1xf32>
    %5 = vector.broadcast %4 : vector<8x1xf32> to vector<8x6xf32>
    %6 = arith.subf %0, %5 : vector<8x6xf32>
    %7 = math.exp %6 : vector<8x6xf32>
    %cst_3 = arith.constant dense<0.000000e+00> : vector<8xf32>
    %8 = vector.multi_reduction <add>, %7, %cst_3 [1] : vector<8x6xf32> to vector<8xf32>
    %9 = vector.shape_cast %8 : vector<8xf32> to vector<8x1xf32>
    %10 = math.log %9 : vector<8x1xf32>
    %11 = vector.extract_strided_slice %1 {offsets = [0, 1], sizes = [8, 1], strides = [1, 1]} : vector<8x2xf32> to vector<8x1xf32>
    %12 = arith.fptosi %11 : vector<8x1xf32> to vector<8x1xi32>
    %13 = tpu.iota {dimensions = array<i32: 1>} : vector<8x6xi32>
    %14 = vector.broadcast %12 : vector<8x1xi32> to vector<8x6xi32>
    %15 = arith.cmpi eq, %14, %13 : vector<8x6xi32>
    %16 = arith.extui %15 : vector<8x6xi1> to vector<8x6xi32>
    %17 = arith.sitofp %16 : vector<8x6xi32> to vector<8x6xf32>
    %18 = arith.mulf %17, %6 : vector<8x6xf32>
    %cst_4 = arith.constant dense<0.000000e+00> : vector<8xf32>
    %19 = vector.multi_reduction <add>, %18, %cst_4 [1] : vector<8x6xf32> to vector<8xf32>
    %20 = vector.shape_cast %19 : vector<8xf32> to vector<8x1xf32>
    %21 = arith.subf %20, %10 : vector<8x1xf32>
    %cst_5 = arith.constant dense<0.000000e+00> : vector<8xf32>
    %22 = vector.multi_reduction <add>, %6, %cst_5 [1] : vector<8x6xf32> to vector<8xf32>
    %23 = vector.shape_cast %22 : vector<8xf32> to vector<8x1xf32>
    %cst_6 = arith.constant 6.000000e+00 : f32
    %24 = vector.broadcast %cst_6 : f32 to vector<8x1xf32>
    %25 = arith.mulf %24, %10 : vector<8x1xf32>
    %26 = arith.subf %23, %25 : vector<8x1xf32>
    %27 = math.exp %2 : vector<8x1xf32>
    %cst_7 = arith.constant 1.000000e+00 : f32
    %28 = vector.broadcast %cst_7 : f32 to vector<8x1xf32>
    %29 = arith.subf %28, %27 : vector<8x1xf32>
    %cst_8 = arith.constant 0.000000e+00 : f32
    %30 = vector.broadcast %cst_8 : f32 to vector<8x1xf32>
    %31 = arith.subf %30, %29 : vector<8x1xf32>
    %32 = arith.mulf %31, %21 : vector<8x1xf32>
    %cst_9 = arith.constant 6.000000e+00 : f32
    %33 = vector.broadcast %cst_9 : f32 to vector<8x1xf32>
    %34 = arith.divf %27, %33 : vector<8x1xf32>
    %35 = arith.mulf %34, %26 : vector<8x1xf32>
    %36 = arith.subf %32, %35 : vector<8x1xf32>
    %c0_10 = arith.constant 0 : index
    %c0_11 = arith.constant 0 : index
    %37 = vector.load %arg3[%c0_10, %c0_11] : memref<8x1xf32, #tpu.memory_space<vmem>>, vector<8x1xf32>
    tpu.vector_store %arg3[%c0_10, %c0_11], %36 {strides = array<i32>} : memref<8x1xf32, #tpu.memory_space<vmem>>, vector<8x1xf32>,
    return
  }
  func.func @transform_0(%arg0: i32) -> (i32, i32) {
    %c0_i32 = arith.constant 0 : i32
    %c0_i32_0 = arith.constant 0 : i32
    return %arg0, %c0_i32 : i32, i32
  }
  func.func @transform_1(%arg0: i32) -> (i32, i32) {
    %c0_i32 = arith.constant 0 : i32
    %c0_i32_0 = arith.constant 0 : i32
    return %arg0, %c0_i32 : i32, i32
  }
  func.func @transform_2(%arg0: i32) -> (i32, i32) {
    %c0_i32 = arith.constant 0 : i32
    %c0_i32_0 = arith.constant 0 : i32
    return %arg0, %c0_i32 : i32, i32
  }
}

</mosaic_0001>

<bundles_post_ra>
// kernel: tpu_custom_call.1
= control target key start
LH: loop header
LB: loop body
LE: loop exit
PB: predicated region body
PF: predicated region fallthrough
CT: control target
= control target key end

     0   :  { %s320_s9 = smov 0   ;;  %s349_s0 = inlined_call_operand.vmem [shape: f32[20,6], index: 0, kind: input, shape index: {}]   ;;  %s350_s1 = inlined_call_operand.vmem [shape: f32[20,2], index: 1, kind: input, shape index: {}]   ;;  %s351_s2 = inlined_call_operand.vmem [shape: f32[20,1], index: 2, kind: output, shape index: {}]  }
   0x1 LB: > { %s265_s10 = sadd.s32 4294967295, %s301_s9   ;;  %p269_p0 = scmp.ge.s32.totalorder %s301_s9, 1  ;;  %s301_s9 = sphi %s320_s9, %s12_s9  }
   0x2   : > { %p120_p1 = scmp.lt.s32.totalorder %s301_s9, 4 }
   0x4   : > { %p121_p2 = pnand %p269_p0, %p120_p1 }
   0x5   : > { %p144_p3 = scmp.lt.s32.totalorder (!%p121_p2), %s265_s10, 2 }
   0x6   : > { %124 = sbr.rel (%p121_p2) target bundleno = 336 (0x150), region = 28 }
   0xb   : > { %v303_v0 = vmov 1   ;;  %s353_s10 = smov (!%p144_p3, %s265_s10), 2  ;;  %vm158_vm0 = vcmask 48128   ;;  %v171_v9 = vlaneseq  ;;  %v304_v12 = vmov 0.0  }
   0xc   : > { %288 = vset.pattern.permute.xlu0 %v303_v0  ;;  %s328_s11 = sshll.u32 %s353_s10, 3  ;;  %vm198_vm2 = vcmask 7168  }
   0xd   : > { %s147_s14 = scalar_lea.vmem %s349_s0, %s328_s11  ;;  %s151_s17 = scalar_lea.vmem %s350_s1, %s328_s11  ;;  %v172_v10 = vand.u32 127, %v171_v9 }
   0xe   : > { %v156_v1 = vld [vmem:[%s147_s14] sm:$0xff]  ;;  %s155_s20 = scalar_lea.vmem %s351_s2, %s328_s11 }
   0xf   : > { %v159_v2 = vsel %vm158_vm0, %v156_v1, -inf  ;;  %v157_v3 = vld [vmem:[%s151_s17] sm:$0xff] }
  0x10   : > { %160 = vmax.xlane.f32.xlu0 %v159_v2  ;;  %v276_v4 = vtrunc.f32 %v157_v3  ;;  %v189_v19 = vmul.f32 1.442695, %v157_v3 }
  0x12   : > { %v277_v5 = vcvt.f32.s32 %v276_v4 }
  0x26   : > { %174 = vperm.xlu0 %288, %v277_v5  }
  0x99   : > { %v161_v6 = vpop.xlane.xlu0 %160 }
  0x9a   : > { %v162_v7 = vsub.f32 %v156_v1, %v161_v6 }
  0x9c   : > { %v163_v8 = vmul.f32 1.442695, %v162_v7  ;;  %v184_v18 = vsel %vm158_vm0, %v162_v7, 0.0 }
  0x9e   : > { %289 = vpow2.f32 %v163_v8 }
  0x9f   : > { %291 = vpow2.f32 %v189_v19 }
  0xa1   : > { %v175_v11 = vpop.permute.xlu0 %174 }
  0xa2   : > { %vm176_vm1 = vcmp.eq.s32.totalorder %v175_v11, %v172_v10 }
  0xa3   : > { %v273_v13 = vsel %vm176_vm1, 1.0, %v304_v12 }
  0xa4   : > { %v179_v16 = vmul.f32 %v273_v13, %v162_v7 }
  0xa6   : > { %v180_v17 = vsel %vm158_vm0, %v179_v16, 0.0 }
  0xab   : > { %v290_v14 = vpop.eup %289 }
  0xac   : > { %v165_v15 = vsel %vm158_vm0, %v290_v14, 0.0  ;;  %v292_v21 = vpop.eup %291 }
  0xad   : > { %166 = vadd.xlane.f32.xlu1 %v165_v15  ;;  %v191_v23 = vsub.f32 1.0, %v292_v21  ;;  %v195_v29 = vmul.f32 0.16666667, %v292_v21 }
  0xaf   : > { %v192_v26 = vsub.f32 0.0, %v191_v23 }
  0xb1   : > { %181 = vadd.xlane.f32.xlu1 %v180_v17 }
  0xb5   : > { %185 = vadd.xlane.f32.xlu1 %v184_v18 }
 0x136   : > { %v167_v20 = vpop.xlane.xlu1 %166 }
 0x137   : > { %293 = vlog2.f32 %v167_v20 }
 0x13a   : > { %v182_v22 = vpop.xlane.xlu1 %181 }
 0x13e   : > { %v186_v30 = vpop.xlane.xlu1 %185 }
 0x144   : > { %v294_v24 = vpop.eup %293 }
 0x145   : > { %v169_v25 = vmul.f32 0.6931472, %v294_v24 }
 0x147   : > { %v183_v27 = vsub.f32 %v182_v22, %v169_v25  ;;  %v187_v28 = vmul.f32 6.0, %v169_v25 }
 0x149   : > { %v188_v31 = vsub.f32 %v186_v30, %v187_v28  ;;  %v193_v32 = vmul.f32 %v192_v26, %v183_v27 }
 0x14b   : > { %v196_v33 = vmul.f32 %v195_v29, %v188_v31 }
 0x14d   : > { %v197_v34 = vsub.f32 %v193_v32, %v196_v33 }
 0x14f   : > { %199 = vst.msk [vmem:[%s155_s20] sm:$0xff] %vm198_vm2, %v197_v34 }
 0x150 PF: > { %s12_s9 = sadd.s32 1, %s301_s9  }
 0x151   : > { %p9_p4 = scmp.ge.s32.totalorder %s12_s9, 5  }
 0x153   :  { %11 = sbr.rel (!%p9_p4) target bundleno = 1 (0x1), region = 61 }

</bundles_post_ra>
